<compile_context>
chip_gen: v6e
topology: v6e:2x2x1
jax: 0.10.0
libtpu: 0.0.40
codegen_flags: <defaults>
</compile_context>

<pallas_src>
import functools

import jax
import jax.numpy as jnp
from jax.experimental import pallas as pl
from jax.experimental.pallas import tpu as pltpu

LANE = 128
ROW_ALIGN = 16          # multiple of 8 (f32 sublane) and 16 (bf16 packed sublane)
MAX_TILE_ROWS = 2048    # 2048 x 128 x 4B = 1 MiB per f32 block (4 MiB double-buffered)
MIN_TILE_ROWS = 256     # below this, per-grid-step overhead starts to dominate


# ----------------------------------------------------------------------------
# Pallas kernel: fused normalize -> fake-quantize -> denorm (all VPU ops)
# ----------------------------------------------------------------------------
def _uniform_quantize_kernel(s_ref, x_ref, o_ref, *, q_max):
    """s_ref (SMEM f32[4]) = [z_min, n_levels/range, out_scale, out_shift]."""
    z_min = s_ref[0]
    fwd_scale = s_ref[1]   # n_levels / (z_max - z_min)   (normalize + /res fused)
    out_scale = s_ref[2]   # (z_max - z_min) / n_levels   (or 1/n_levels if no denorm)
    out_shift = s_ref[3]   # z_min                        (or 0 if no denorm)

    x = x_ref[...].astype(jnp.float32)
    # torch.fake_quantize_per_tensor_affine(x_scaled, res, 0, 0, n_levels):
    #   q = clamp(round(x_scaled / res), 0, n_levels); x_quant = q * res
    # fused with the min/max normalization and the denorm affine.
    q = jnp.clip(jnp.round((x - z_min) * fwd_scale), 0.0, q_max)
    o_ref[...] = (q * out_scale + out_shift).astype(o_ref.dtype)


# ----------------------------------------------------------------------------
# Tiling helper
# ----------------------------------------------------------------------------
def _pick_tile_rows(rows):
    """Largest row tile <= MAX_TILE_ROWS, preferring one that divides `rows` exactly
    (so no row padding / extra HBM copy is needed)."""
    if rows <= MAX_TILE_ROWS:
        return rows
    for t in range(MAX_TILE_ROWS, MIN_TILE_ROWS - 1, -ROW_ALIGN):
        if rows % t == 0:
            return t
    return MAX_TILE_ROWS  # fall back: wrapper pads rows up to a tile multiple


# ----------------------------------------------------------------------------
# Wrapper
# ----------------------------------------------------------------------------
def uniform_quantize(x, z_min, z_max, *, bits=16, return_denorm=True):
    """UniformQuantize.forward as a single Pallas TPU kernel."""
    n_levels = 2 ** bits - 1  # quant_max
    z_min = jnp.asarray(z_min, jnp.float32)
    z_max = jnp.asarray(z_max, jnp.float32)
    z_range = z_max - z_min

    fwd_scale = jnp.float32(n_levels) / z_range
    if return_denorm:
        out_scale = z_range / jnp.float32(n_levels)
        out_shift = z_min
    else:
        out_scale = jnp.float32(1.0 / n_levels)
        out_shift = jnp.float32(0.0)
    scalars = jnp.stack([z_min, fwd_scale, out_scale, out_shift]).astype(jnp.float32)

    orig_shape = x.shape
    orig_dtype = x.dtype
    # Keep 16-bit floats native through HBM (halves memory traffic); everything
    # else goes through f32. Compute is always f32 inside the kernel.
    io_dtype = orig_dtype if orig_dtype in (jnp.float32, jnp.bfloat16) else jnp.float32

    flat = x.reshape(-1).astype(io_dtype)
    n = flat.shape[0]

    # Lane-dense layout: pad to a whole (ROW_ALIGN, 128) multiple, pick a row tile,
    # and pad rows to a tile multiple only if the tile does not divide evenly.
    vchunk = ROW_ALIGN * LANE
    rows = pl.cdiv(n, vchunk) * ROW_ALIGN              # multiple of 16
    tile_rows = _pick_tile_rows(rows)                  # multiple of 16
    rows_pad = pl.cdiv(rows, tile_rows) * tile_rows
    n_pad = rows_pad * LANE
    if n_pad != n:
        flat = jnp.pad(flat, (0, n_pad - n))
    x2 = flat.reshape(rows_pad, LANE)

    # Alias the input slab as the output buffer only when it is guaranteed to be a
    # fresh intermediate (pad or dtype cast happened) -> saves one HBM allocation
    # without ever forcing XLA to insert a defensive copy.
    fresh_slab = (n_pad != n) or (io_dtype != orig_dtype)
    aliases = {1: 0} if fresh_slab else {}

    out = pl.pallas_call(
        functools.partial(_uniform_quantize_kernel, q_max=float(n_levels)),
        out_shape=jax.ShapeDtypeStruct((rows_pad, LANE), io_dtype),
        grid=(rows_pad // tile_rows,),
        in_specs=[
            pl.BlockSpec(memory_space=pltpu.MemorySpace.SMEM),      # scalars
            pl.BlockSpec((tile_rows, LANE), lambda i: (i, 0)),      # x slab
        ],
        out_specs=pl.BlockSpec((tile_rows, LANE), lambda i: (i, 0)),
        input_output_aliases=aliases,
        compiler_params=pltpu.CompilerParams(dimension_semantics=("parallel",)),
    )(scalars, x2)

    out = out.reshape(-1)[:n].reshape(orig_shape)
    return out.astype(orig_dtype)


# Pure-JAX reference (mirrors the torch op sequence) for correctness checking.
def uniform_quantize_ref(x, z_min, z_max, *, bits=16, return_denorm=True):
    n_levels = 2 ** bits - 1
    res = 1.0 / n_levels
    x_scaled = (x - z_min) / (z_max - z_min)
    q = jnp.clip(jnp.round(x_scaled / res), 0.0, float(n_levels))
    x_quant = q * res
    if return_denorm:
        return x_quant * (z_max - z_min) + z_min
    return x_quant


if __name__ == "__main__":
    key = jax.random.PRNGKey(0)
    # Latent-like input (e.g. a DeepCMC encoder output): batch=2, chan=4, 16x16.
    x = jax.random.normal(key, (2, 4, 16, 16), jnp.float32)

    # In cmc_net, reset_extrema(z_min, z_max) is fed the encoder-output extrema.
    z_min = jnp.min(x)
    z_max = jnp.max(x)

    fwd = jax.jit(functools.partial(uniform_quantize, bits=16, return_denorm=True))
    out = fwd(x, z_min, z_max)
    jax.block_until_ready(out)

    ref = uniform_quantize_ref(x, z_min, z_max)
    step = float((z_max - z_min) / (2 ** 16 - 1))  # one quantization step

    assert out.shape == x.shape
    assert out.dtype == x.dtype
    assert bool(jnp.isfinite(out).all())
    # allow at most one quantization step of slack for fused-constant rounding
    assert float(jnp.max(jnp.abs(out - ref))) <= 1.5 * step
    print("KERNEL_OK")
</pallas_src>

<mosaic_0001>
module attributes {stable_mosaic.version = 11 : i64} {
  func.func @_uniform_quantize_kernel(%arg0: i32, %arg1: memref<4xf32, #tpu.memory_space<smem>>, %arg2: memref<16x128xf32, #tpu.memory_space<vmem>>, %arg3: memref<16x128xf32, #tpu.memory_space<vmem>>) attributes {dimension_semantics = [#tpu.dimension_semantics<parallel>], iteration_bounds = array<i64: 1>, scalar_prefetch = 0 : i64, scratch_operands = 0 : i64, tpu.core_type = #tpu.core_type<tc>, window_params = [{transform_indices = @transform_0, window_bounds = array<i64: 4>}, {transform_indices = @transform_1, window_bounds = array<i64: 16, 128>}, {transform_indices = @transform_2, window_bounds = array<i64: 16, 128>}]} {
    %c0 = arith.constant 0 : index
    %0 = memref.load %arg1[%c0] : memref<4xf32, #tpu.memory_space<smem>>
    %c1 = arith.constant 1 : index
    %1 = memref.load %arg1[%c1] : memref<4xf32, #tpu.memory_space<smem>>
    %c2 = arith.constant 2 : index
    %2 = memref.load %arg1[%c2] : memref<4xf32, #tpu.memory_space<smem>>
    %c3 = arith.constant 3 : index
    %3 = memref.load %arg1[%c3] : memref<4xf32, #tpu.memory_space<smem>>
    %c0_0 = arith.constant 0 : index
    %c0_1 = arith.constant 0 : index
    %4 = vector.load %arg2[%c0_0, %c0_1] : memref<16x128xf32, #tpu.memory_space<vmem>>, vector<16x128xf32>
    %5 = vector.broadcast %0 : f32 to vector<16x128xf32>
    %6 = arith.subf %4, %5 : vector<16x128xf32>
    %7 = vector.broadcast %1 : f32 to vector<16x128xf32>
    %8 = arith.mulf %6, %7 : vector<16x128xf32>
    %9 = math.roundeven %8 : vector<16x128xf32>
    %cst = arith.constant 0.000000e+00 : f32
    %cst_2 = arith.constant 6.553500e+04 : f32
    %10 = vector.broadcast %cst : f32 to vector<16x128xf32>
    %11 = arith.maximumf %10, %9 : vector<16x128xf32>
    %12 = vector.broadcast %cst_2 : f32 to vector<16x128xf32>
    %13 = arith.minimumf %12, %11 : vector<16x128xf32>
    %14 = vector.broadcast %2 : f32 to vector<16x128xf32>
    %15 = arith.mulf %13, %14 : vector<16x128xf32>
    %16 = vector.broadcast %3 : f32 to vector<16x128xf32>
    %17 = arith.addf %15, %16 : vector<16x128xf32>
    %c0_3 = arith.constant 0 : index
    %c0_4 = arith.constant 0 : index
    %18 = vector.load %arg3[%c0_3, %c0_4] : memref<16x128xf32, #tpu.memory_space<vmem>>, vector<16x128xf32>
    tpu.vector_store %arg3[%c0_3, %c0_4], %17 {strides = array<i32>} : memref<16x128xf32, #tpu.memory_space<vmem>>, vector<16x128xf32>,
    return
  }
  func.func @transform_0(%arg0: i32) -> i32 {
    %c0_i32 = arith.constant 0 : i32
    %c0_i32_0 = arith.constant 0 : i32
    return %c0_i32 : i32
  }
  func.func @transform_1(%arg0: i32) -> (i32, i32) {
    %c0_i32 = arith.constant 0 : i32
    %c0_i32_0 = arith.constant 0 : i32
    return %arg0, %c0_i32 : i32, i32
  }
  func.func @transform_2(%arg0: i32) -> (i32, i32) {
    %c0_i32 = arith.constant 0 : i32
    %c0_i32_0 = arith.constant 0 : i32
    return %arg0, %c0_i32 : i32, i32
  }
}

</mosaic_0001>

<bundles_post_ra>
// kernel: uniform_quantize.1
= control target key start
LH: loop header
LB: loop body
LE: loop exit
PB: predicated region body
PF: predicated region fallthrough
CT: control target
= control target key end

     0   :  { %7 = vsyncpa [#allocation3], 0  ;;  %s120_s0 = inlined_call_operand.vmem [shape: f32[4], index: 0, kind: input, shape index: {}]   ;;  %s121_s1 = inlined_call_operand.vmem [shape: f32[16,128], index: 1, kind: input, shape index: {}]   ;;  %s122_s2 = inlined_call_operand.vmem [shape: f32[16,128], index: 2, kind: output, shape index: {}]  }
   0x1   :  { %s14_s11 = sshll.u32 %s120_s0, 4  ;;  %s15_s11 = int_to_ptr.vmem [resolvable:$true] %s14_s11 }
   0x2   :  { %s75_s12 = scalar_lea.vmem %s15_s11, 16  ;;  %p80_p1 = scmp.lt.s32.totalorder %s15_s11, %s15_s11 }
   0x3   :  { %p76_p0 = scmp.ne.s32.totalorder %s15_s11, %s75_s12  ;;  %p81_p2 = scmp.lt.s32.totalorder %s75_s12, %s75_s12 }
   0x5   :  { %p82_p3 = por %p81_p2, %p80_p1 }
   0x7   :  { %p83_p4 = pnand %p82_p3, %p76_p0 }
   0x9   :  { %86 = shalt.err (!%p83_p4)
}
   0xa   :  { %s89_s13 = smov [#allocation2]  }
   0xb   :  { %17 = dma.vmem_to_smem %s15_s11, 16, %s89_s13, [#allocation3]  }
   0xc   :  { %87 = dma.done.wait [#allocation3], 16  }
   0xd   :  { %88 = vsyncadd [#allocation3], 4294967280 }
   0xe   :  { %23 = sfence }
   0xf   :  { %s24_s14 = sld [smem:[#allocation2]]  ;;  %v28_v0 = vld [vmem:[%s121_s1] sm:$0xff]  ;;  %v29_v1 = vld [vmem:[%s121_s1 + $0x8] sm:$0xff] }
  0x10   :  { %s55_s15 = sld [smem:[#allocation2 + $0x1]] }
  0x11   :  { %s56_s19 = sld [smem:[#allocation2 + $0x2]] }
  0x12   :  { %s57_s20 = sld [smem:[#allocation2 + $0x3]] }
  0x15   :  { %v30_v2 = vstv %s24_s14 }
  0x16   :  { %v31_v3 = vsub.f32 %v28_v0, %v30_v2  ;;  %v33_v4 = vstv %s55_s15  ;;  %v32_v5 = vsub.f32 %v29_v1, %v30_v2 }
  0x17   :  { %v42_v23 = vstv %s56_s19 }
  0x18   :  { %v34_v6 = vmul.f32 %v33_v4, %v31_v3  ;;  %v35_v7 = vmul.f32 %v33_v4, %v32_v5  ;;  %v45_v26 = vstv %s57_s20 }
  0x1a   :  { %v60_v8 = vcvt.f32.s32 %v34_v6  ;;  %v58_v9 = vand.u32 2147483647, %v34_v6  ;;  %v68_v10 = vcvt.f32.s32 %v35_v7  ;;  %v63_v12 = vand.u32 2147483648, %v34_v6 }
  0x1b   :  { %v66_v13 = vand.u32 2147483647, %v35_v7  ;;  %v71_v15 = vand.u32 2147483648, %v35_v7 }
  0x1c   :  { %v61_v11 = vcvt.s32.f32 %v60_v8  ;;  %v69_v14 = vcvt.s32.f32 %v68_v10  ;;  %vm59_vm0 = vcmp.lt.f32.partialorder %v58_v9, 8388608.0 }
  0x1d   :  { %vm67_vm1 = vcmp.lt.f32.partialorder %v66_v13, 8388608.0 }
  0x1e   :  { %v62_v16 = vand.u32 2147483647, %v61_v11  ;;  %v70_v17 = vand.u32 2147483647, %v69_v14 }
  0x20   :  { %v64_v18 = vor.u32 %v63_v12, %v62_v16  ;;  %v72_v19 = vor.u32 %v71_v15, %v70_v17 }
  0x22   :  { %v65_v20 = vsel %vm59_vm0, %v64_v18, %v34_v6  ;;  %v73_v22 = vsel %vm67_vm1, %v72_v19, %v35_v7 }
  0x23   :  { %v38_v21 = vmax.f32 %v65_v20, 0.0  ;;  %v39_v24 = vmax.f32 %v73_v22, 0.0 }
  0x25   :  { %v40_v25 = vmin.f32 %v38_v21, 65535.0  ;;  %v41_v27 = vmin.f32 %v39_v24, 65535.0 }
  0x27   :  { %v43_v28 = vmul.f32 %v42_v23, %v40_v25  ;;  %v44_v29 = vmul.f32 %v42_v23, %v41_v27 }
  0x29   :  { %v46_v30 = vadd.f32 %v45_v26, %v43_v28  ;;  %v47_v31 = vadd.f32 %v45_v26, %v44_v29 }
  0x2b   :  { %48 = vst [vmem:[%s122_s2] sm:$0xff] %v46_v30  ;;  %49 = vst [vmem:[%s122_s2 + $0x8] sm:$0xff] %v47_v31 }
  0x2c   :  { %54 = vsyncpa [#allocation3], 1 }

</bundles_post_ra>
